<compile_context>
chip_gen: v7x
topology: tpu7x:2x2x1
jax: 0.10.0
libtpu: 0.0.40
codegen_flags: <defaults>
</compile_context>

<pallas_src>
import jax
import jax.numpy as jnp
from jax.experimental import pallas as pl
from jax.experimental.pallas import tpu as pltpu

IN_F = 3       # fc1 in_features
KPAD = 8       # fc1 in_features zero-padded to the sublane granularity
HID = 64       # fc1 out_features / fc2 in_features
OUT_F = 1      # fc2 out_features
LANE = 128     # TPU lane granularity (batch now lives on the lane axis)
MAX_TB = 8192  # max batch columns per grid step


def _round_up(n, m):
    return ((n + m - 1) // m) * m


def _choose_tiling(B):
    """Balanced lane-aligned batch tiles; >=2 tiles when possible (megacore)."""
    n_tiles = max(1, pl.cdiv(B, MAX_TB))
    if n_tiles == 1 and B > LANE:
        n_tiles = 2                      # let v7x shard the batch over both TCs
    tb = _round_up(pl.cdiv(B, n_tiles), LANE)
    return tb, tb * n_tiles, n_tiles


def _attack_mlp_kernel(x_ref, w1_ref, b1_ref, w2_ref, b2_ref, o_ref):
    """Feature-major tile: o = sigmoid(w2 . relu(W1 @ x + b1) + b2).

    Shapes:
      x_ref:  (KPAD, TB) VMEM     w1_ref: (HID, KPAD) VMEM
      b1_ref: (HID, 1)   VMEM     w2_ref: (HID, 1)    VMEM
      b2_ref: (1, 1)     SMEM     o_ref:  (OUT_F, TB) VMEM
    """
    # fc1 on the MXU (idle otherwise; VALU is the binding slot).  Padded
    # input rows 3..7 are zeros, so the result is identical to K=3.
    h = jnp.dot(w1_ref[...], x_ref[...],
                preferred_element_type=jnp.float32)          # (HID, TB)
    h = jnp.maximum(h + b1_ref[...], 0.0)                    # bias + ReLU (VPU)
    # fc2: elementwise mul (VPU) + cross-sublane reduce (XLU) -> (1, TB).
    z = jnp.sum(h * w2_ref[...], axis=0, keepdims=True) + b2_ref[0, 0]
    o_ref[...] = jax.nn.sigmoid(z)                           # EUP exp/recip


def prepare_params(w1, b1, w2, b2):
    """One-time transform of PyTorch-layout params into kernel layout."""
    w1_k = jnp.zeros((HID, KPAD), jnp.float32)
    w1_k = w1_k.at[:, :IN_F].set(jnp.asarray(w1, jnp.float32))   # (64, 8) [out, in]
    b1_k = jnp.asarray(b1, jnp.float32).reshape(HID, 1)          # (64, 1)
    # (1, 64) -> (64, 1): flat order is preserved, equivalent to transpose.
    w2_k = jnp.asarray(w2, jnp.float32).reshape(HID, 1)          # (64, 1)
    b2_k = jnp.asarray(b2, jnp.float32).reshape(1, 1)            # (1, 1) -> SMEM
    return w1_k, b1_k, w2_k, b2_k


@jax.jit
def attack_model_forward(x, w1_k, b1_k, w2_k, b2_k):
    """x: (B, 3) f32; params from prepare_params(). Returns (B, 1) f32."""
    B = x.shape[0]
    TB, Bp, n_tiles = _choose_tiling(B)

    # Feature-major HBM layout (KPAD, Bp): per-step input DMA is 8 contiguous
    # TB*4-byte rows instead of TB strided 12-byte rows.  Zero-padded batch
    # columns are sliced off below; zero feature rows contribute nothing.
    x_t = jnp.pad(x.astype(jnp.float32).T,
                  ((0, KPAD - IN_F), (0, Bp - B)))               # (8, Bp)

    cost = pl.CostEstimate(
        flops=int(Bp) * (2 * KPAD * HID + 2 * HID + 2 * HID + 2),
        transcendentals=int(Bp),
        bytes_accessed=int(Bp) * (KPAD + OUT_F) * 4
        + (HID * KPAD + 2 * HID + 1) * 4,
    )

    out_t = pl.pallas_call(
        _attack_mlp_kernel,
        out_shape=jax.ShapeDtypeStruct((OUT_F, Bp), jnp.float32),
        grid=(n_tiles,),
        in_specs=[
            pl.BlockSpec((KPAD, TB), lambda i: (0, i)),          # x: lane-tiled
            pl.BlockSpec((HID, KPAD), lambda i: (0, 0)),         # w1: resident
            pl.BlockSpec((HID, 1), lambda i: (0, 0)),            # b1: resident
            pl.BlockSpec((HID, 1), lambda i: (0, 0)),            # w2: resident
            pl.BlockSpec(memory_space=pltpu.MemorySpace.SMEM),   # b2: scalar in SMEM
        ],
        out_specs=pl.BlockSpec((OUT_F, TB), lambda i: (0, i)),   # lane-dense out
        compiler_params=pltpu.CompilerParams(
            dimension_semantics=("parallel",)),
        cost_estimate=cost,
    )(x_t, w1_k, b1_k, w2_k, b2_k)

    return out_t[:, :B].reshape(B, OUT_F)


def init_params(key):
    """nn.Linear default init: U[-1/sqrt(fan_in), 1/sqrt(fan_in)]."""
    k1, k2, k3, k4 = jax.random.split(key, 4)
    bound1 = 1.0 / jnp.sqrt(IN_F)
    bound2 = 1.0 / jnp.sqrt(HID)
    w1 = jax.random.uniform(k1, (HID, IN_F), jnp.float32, -bound1, bound1)
    b1 = jax.random.uniform(k2, (HID,), jnp.float32, -bound1, bound1)
    w2 = jax.random.uniform(k3, (OUT_F, HID), jnp.float32, -bound2, bound2)
    b2 = jax.random.uniform(k4, (OUT_F,), jnp.float32, -bound2, bound2)
    return w1, b1, w2, b2


if __name__ == "__main__":
    key = jax.random.PRNGKey(0)
    k_x, k_x2, k_p = jax.random.split(key, 3)

    w1, b1, w2, b2 = init_params(k_p)
    params = prepare_params(w1, b1, w2, b2)

    def ref_fn(x):
        # Full-precision reference (the kernel's fc1 now runs on the MXU,
        # whose f32 matmul may use reduced-precision passes -> tolerance
        # below is 3e-3 instead of 1e-5).
        h = jnp.maximum(
            jnp.dot(x, w1.T, precision=jax.lax.Precision.HIGHEST) + b1, 0.0)
        z = jnp.dot(h, w2.T, precision=jax.lax.Precision.HIGHEST) + b2
        return jax.nn.sigmoid(z)

    # Small batch: single grid step.
    B = 8
    x = jax.random.normal(k_x, (B, IN_F), jnp.float32)
    out = jax.block_until_ready(attack_model_forward(x, *params))
    assert out.shape == (B, OUT_F)
    assert jnp.allclose(out, ref_fn(x), atol=3e-3)

    # Larger batch: multiple grid steps + batch-padding path.
    B2 = 1037
    x2 = jax.random.normal(k_x2, (B2, IN_F), jnp.float32)
    out2 = jax.block_until_ready(attack_model_forward(x2, *params))
    assert out2.shape == (B2, OUT_F)
    assert jnp.allclose(out2, ref_fn(x2), atol=3e-3)

    print("KERNEL_OK")
</pallas_src>

<mosaic_0001>
module attributes {stable_mosaic.version = 11 : i64} {
  func.func @_attack_mlp_kernel(%arg0: i32, %arg1: memref<8x128xf32, #tpu.memory_space<vmem>>, %arg2: memref<64x8xf32, #tpu.memory_space<vmem>>, %arg3: memref<64x1xf32, #tpu.memory_space<vmem>>, %arg4: memref<64x1xf32, #tpu.memory_space<vmem>>, %arg5: memref<1x1xf32, #tpu.memory_space<smem>>, %arg6: memref<1x128xf32, #tpu.memory_space<vmem>>) attributes {dimension_semantics = [#tpu.dimension_semantics<parallel>], iteration_bounds = array<i64: 1>, scalar_prefetch = 0 : i64, scratch_operands = 0 : i64, tpu.core_type = #tpu.core_type<tc>, window_params = [{transform_indices = @transform_0, window_bounds = array<i64: 8, 128>}, {pipeline_mode = #tpu.pipeline_mode<synchronous>, transform_indices = @transform_1, window_bounds = array<i64: 64, 8>}, {pipeline_mode = #tpu.pipeline_mode<synchronous>, transform_indices = @transform_2, window_bounds = array<i64: 64, 1>}, {pipeline_mode = #tpu.pipeline_mode<synchronous>, transform_indices = @transform_3, window_bounds = array<i64: 64, 1>}, {transform_indices = @transform_4, window_bounds = array<i64: 1, 1>}, {transform_indices = @transform_5, window_bounds = array<i64: 1, 128>}]} {
    %c0 = arith.constant 0 : index
    %c0_0 = arith.constant 0 : index
    %0 = vector.load %arg2[%c0, %c0_0] : memref<64x8xf32, #tpu.memory_space<vmem>>, vector<64x8xf32>
    %c0_1 = arith.constant 0 : index
    %c0_2 = arith.constant 0 : index
    %1 = vector.load %arg1[%c0_1, %c0_2] : memref<8x128xf32, #tpu.memory_space<vmem>>, vector<8x128xf32>
    %cst = arith.constant dense<0.000000e+00> : vector<64x128xf32>
    %2 = tpu.matmul %0, %1, %cst {dimension_numbers = #tpu.dot_dimension_numbers<[1], [0], [0], [1], [0, 0, 1, 1], [], []>} : vector<64x8xf32>, vector<8x128xf32>, vector<64x128xf32> -> vector<64x128xf32>
    %c0_3 = arith.constant 0 : index
    %c0_4 = arith.constant 0 : index
    %3 = vector.load %arg3[%c0_3, %c0_4] : memref<64x1xf32, #tpu.memory_space<vmem>>, vector<64x1xf32>
    %4 = vector.broadcast %3 : vector<64x1xf32> to vector<64x128xf32>
    %5 = arith.addf %2, %4 : vector<64x128xf32>
    %cst_5 = arith.constant 0.000000e+00 : f32
    %6 = vector.broadcast %cst_5 : f32 to vector<64x128xf32>
    %7 = arith.maximumf %5, %6 : vector<64x128xf32>
    %c0_6 = arith.constant 0 : index
    %c0_7 = arith.constant 0 : index
    %8 = vector.load %arg4[%c0_6, %c0_7] : memref<64x1xf32, #tpu.memory_space<vmem>>, vector<64x1xf32>
    %9 = vector.broadcast %8 : vector<64x1xf32> to vector<64x128xf32>
    %10 = arith.mulf %7, %9 : vector<64x128xf32>
    %cst_8 = arith.constant dense<0.000000e+00> : vector<128xf32>
    %11 = vector.multi_reduction <add>, %10, %cst_8 [0] : vector<64x128xf32> to vector<128xf32>
    %12 = vector.shape_cast %11 : vector<128xf32> to vector<1x128xf32>
    %c0_9 = arith.constant 0 : index
    %c0_10 = arith.constant 0 : index
    %13 = memref.load %arg5[%c0_9, %c0_10] : memref<1x1xf32, #tpu.memory_space<smem>>
    %14 = vector.broadcast %13 : f32 to vector<1x128xf32>
    %15 = arith.addf %12, %14 : vector<1x128xf32>
    %16 = arith.negf %15 : vector<1x128xf32>
    %17 = math.exp %16 : vector<1x128xf32>
    %cst_11 = arith.constant 1.000000e+00 : f32
    %18 = vector.broadcast %cst_11 : f32 to vector<1x128xf32>
    %19 = arith.addf %18, %17 : vector<1x128xf32>
    %20 = arith.divf %18, %19 : vector<1x128xf32>
    %c0_12 = arith.constant 0 : index
    %c0_13 = arith.constant 0 : index
    %21 = vector.load %arg6[%c0_12, %c0_13] : memref<1x128xf32, #tpu.memory_space<vmem>>, vector<1x128xf32>
    tpu.vector_store %arg6[%c0_12, %c0_13], %20 {strides = array<i32>} : memref<1x128xf32, #tpu.memory_space<vmem>>, vector<1x128xf32>,
    return
  }
  func.func @transform_0(%arg0: i32) -> (i32, i32) {
    %c0_i32 = arith.constant 0 : i32
    %c0_i32_0 = arith.constant 0 : i32
    return %c0_i32, %arg0 : i32, i32
  }
  func.func @transform_1(%arg0: i32) -> (i32, i32) {
    %c0_i32 = arith.constant 0 : i32
    %c0_i32_0 = arith.constant 0 : i32
    %c0_i32_1 = arith.constant 0 : i32
    return %c0_i32, %c0_i32_0 : i32, i32
  }
  func.func @transform_2(%arg0: i32) -> (i32, i32) {
    %c0_i32 = arith.constant 0 : i32
    %c0_i32_0 = arith.constant 0 : i32
    %c0_i32_1 = arith.constant 0 : i32
    return %c0_i32, %c0_i32_0 : i32, i32
  }
  func.func @transform_3(%arg0: i32) -> (i32, i32) {
    %c0_i32 = arith.constant 0 : i32
    %c0_i32_0 = arith.constant 0 : i32
    %c0_i32_1 = arith.constant 0 : i32
    return %c0_i32, %c0_i32_0 : i32, i32
  }
  func.func @transform_4(%arg0: i32) -> (i32, i32) {
    %c0_i32 = arith.constant 0 : i32
    %c0_i32_0 = arith.constant 0 : i32
    %c0_i32_1 = arith.constant 0 : i32
    return %c0_i32, %c0_i32_0 : i32, i32
  }
  func.func @transform_5(%arg0: i32) -> (i32, i32) {
    %c0_i32 = arith.constant 0 : i32
    %c0_i32_0 = arith.constant 0 : i32
    return %c0_i32, %arg0 : i32, i32
  }
}

</mosaic_0001>

<bundles_post_ra>
// kernel: attack_model_forward.1
= control target key start
LH: loop header
LB: loop body
LE: loop exit
PB: predicated region body
PF: predicated region fallthrough
CT: control target
= control target key end

     0   :  { %vm78_vm0 = vcmask 64512   ;;  %v340_v3 = vmov 0   ;;  %s460_s0 = inlined_call_operand.vmem [shape: f32[8,128], index: 0, kind: input, shape index: {}]   ;;  %s461_s1 = inlined_call_operand.vmem [shape: f32[64,8], index: 1, kind: input, shape index: {}]   ;;  %s462_s2 = inlined_call_operand.vmem [shape: f32[64,1], index: 2, kind: input, shape index: {}]   ;;  %s463_s3 = inlined_call_operand.vmem [shape: f32[64,1], index: 3, kind: input, shape index: {}]   ;;  %s464_s4 = inlined_call_operand.<no memory space> [shape: f32[1,1], index: 4, kind: input, shape index: {}]   ;;  %s465_s5 = inlined_call_operand.vmem [shape: f32[1,128], index: 5, kind: output, shape index: {}]  }
   0x1   :  { %v29_v0 = vld [vmem:[%s460_s0] sm:$0xff]  ;;  %334 = vset.pattern.permute.xlu0 %v340_v3  ;;  %335 = vset.pattern.permute.xlu1 %v340_v3  ;;  %v22_v4 = vld [vmem:[%s461_s1 + $0x8] sm:$0xff]  ;;  %v23_v6 = vld [vmem:[%s461_s1 + $0x10] sm:$0xff] }
   0x2   :  { %v21_v1 = vld [vmem:[%s461_s1] sm:$0xff]  ;;  %317 = vmatprep.subr.mxu0 %v29_v0  ;;  %331 = vmatprep.subr.mxu1 %v29_v0  ;;  %v26_v5 = vld [vmem:[%s461_s1 + $0x28] sm:$0xff]  ;;  %v27_v7 = vld [vmem:[%s461_s1 + $0x30] sm:$0xff] }
   0x3   :  { %v25_v2 = vld [vmem:[%s461_s1 + $0x20] sm:$0xff]  ;;  %318 = vmatpush3.msra.mxu0 %v29_v0  ;;  %332 = vmatpush3.msra.mxu1 %v29_v0  ;;  %v32_v9 = vld [vmem:[%s462_s2 + $0x10] sm:$0xff]  ;;  %v24_v10 = vld [vmem:[%s461_s1 + $0x18] sm:$0xff] }
   0x4   :  { %319 = vmatprep.mubr.msk.f32.mxu0 %vm78_vm0, %v21_v1  ;;  %325 = vmatprep.mubr.msk.f32.mxu1 %vm78_vm0, %v25_v2  ;;  %v30_v8 = vld [vmem:[%s462_s2] sm:$0xff]  ;;  %v28_v11 = vld [vmem:[%s461_s1 + $0x38] sm:$0xff]  ;;  %v31_v12 = vld [vmem:[%s462_s2 + $0x8] sm:$0xff] }
   0x5   :  { %320 = vmatmul.mubr.msk.f32.vlgmr.msra.gmra.mrb[0].mxu0 %vm78_vm0, %v22_v4  ;;  %326 = vmatmul.mubr.msk.f32.vlgmr.msra.gmra.mrb[0].mxu1 %vm78_vm0, %v26_v5  ;;  %v33_v13 = vld [vmem:[%s462_s2 + $0x18] sm:$0xff]  ;;  %v216_v14 = vld [vmem:[%s463_s3] sm:$0xff]  ;;  %v217_v15 = vld [vmem:[%s463_s3 + $0x8] sm:$0xff] }
   0x6   :  { %322 = vmatprep.mubr.msk.f32.mxu0 %vm78_vm0, %v23_v6  ;;  %328 = vmatprep.mubr.msk.f32.mxu1 %vm78_vm0, %v27_v7  ;;  %v34_v16 = vld [vmem:[%s462_s2 + $0x20] sm:$0xff]  ;;  %v218_v17 = vld [vmem:[%s463_s3 + $0x10] sm:$0xff]  ;;  %v35_v18 = vld [vmem:[%s462_s2 + $0x28] sm:$0xff] }
   0x7   :  { %40 = vperm.xlu0 %334, %v30_v8   ;;  %50 = vperm.xlu1 %335, %v32_v9   ;;  %v219_v19 = vld [vmem:[%s463_s3 + $0x18] sm:$0xff]  ;;  %v36_v20 = vld [vmem:[%s462_s2 + $0x30] sm:$0xff]  ;;  %v220_v21 = vld [vmem:[%s463_s3 + $0x20] sm:$0xff] }
   0x8   :  { %v37_v22 = vld [vmem:[%s462_s2 + $0x38] sm:$0xff]  ;;  %v221_v23 = vld [vmem:[%s463_s3 + $0x28] sm:$0xff]  ;;  %v222_v24 = vld [vmem:[%s463_s3 + $0x30] sm:$0xff] }
   0x9   :  { %323 = vmatmul.mubr.msk.f32.gmra.mrb[2].mxu0 %vm78_vm0, %v24_v10  ;;  %329 = vmatmul.mubr.msk.f32.gmra.mrb[2].mxu1 %vm78_vm0, %v28_v11  ;;  %v223_v25 = vld [vmem:[%s463_s3 + $0x38] sm:$0xff] }
   0xb   :  { %45 = vperm.xlu0 %334, %v31_v12   ;;  %55 = vperm.xlu1 %335, %v33_v13  }
   0xf   :  { %226 = vperm.xlu0 %334, %v216_v14   ;;  %231 = vperm.xlu1 %335, %v217_v15  }
  0x13   :  { %60 = vperm.xlu0 %334, %v34_v16   ;;  %236 = vperm.xlu1 %335, %v218_v17  }
  0x17   :  { %65 = vperm.xlu0 %334, %v35_v18   ;;  %241 = vperm.xlu1 %335, %v219_v19  }
  0x1b   :  { %70 = vperm.xlu0 %334, %v36_v20   ;;  %246 = vperm.xlu1 %335, %v220_v21  }
  0x1f   :  { %75 = vperm.xlu0 %334, %v37_v22   ;;  %251 = vperm.xlu1 %335, %v221_v23   ;;  %v286_v22 = vstv %s464_s4 }
  0x23   :  { %256 = vperm.xlu0 %334, %v222_v24   ;;  %261 = vperm.xlu1 %335, %v223_v25  }
  0x86   :  { %v41_v26 = vpop.permute.xlu0 %40  ;;  %v51_v27 = vpop.permute.xlu1 %50 }
  0x8a   :  { %v46_v28 = vpop.permute.xlu0 %45  ;;  %v56_v29 = vpop.permute.xlu1 %55 }
  0x8e   :  { %v227_v30 = vpop.permute.xlu0 %226  ;;  %v232_v31 = vpop.permute.xlu1 %231 }
  0x92   :  { %v61_v32 = vpop.permute.xlu0 %60  ;;  %v237_v33 = vpop.permute.xlu1 %236 }
  0x96   :  { %v66_v34 = vpop.permute.xlu0 %65  ;;  %v242_v35 = vpop.permute.xlu1 %241 }
  0x9a   :  { %v71_v42 = vpop.permute.xlu0 %70  ;;  %v247_v54 = vpop.permute.xlu1 %246 }
  0x9e   :  { %v76_v62 = vpop.permute.xlu0 %75  ;;  %v252_v3 = vpop.permute.xlu1 %251 }
  0xa2   :  { %v257_v10 = vpop.permute.xlu0 %256  ;;  %v262_v13 = vpop.permute.xlu1 %261 }
  0xd8   :  { %v321_v36 = vpop.f32.mrb[0].mxu0  ;;  %v327_v37 = vpop.f32.mrb[0].mxu1 }
  0xd9   :  { %v175_v38 = vadd.f32 %v321_v36, %v46_v28  ;;  %v169_v39 = vpop.f32.mrb[1].mxu0  ;;  %v189_v40 = vpop.f32.mrb[1].mxu1  ;;  %v195_v55 = vadd.f32 %v327_v37, %v66_v34 }
  0xda   :  { %v170_v41 = vadd.f32 %v169_v39, %v41_v26  ;;  %v190_v52 = vadd.f32 %v189_v40, %v61_v32 }
  0xdb   :  { %v209_v43 = vmax.f32 %v175_v38, 0.0  ;;  %v213_v63 = vmax.f32 %v195_v55, 0.0 }
  0xdc   :  { %v208_v44 = vmax.f32 %v170_v41, 0.0  ;;  %v324_v45 = vpop.f32.mrb[2].mxu0  ;;  %v330_v46 = vpop.f32.mrb[2].mxu1  ;;  %v212_v59 = vmax.f32 %v190_v52, 0.0 }
  0xdd   :  { %v265_v47 = vmul.f32 %v232_v31, %v209_v43  ;;  %v185_v48 = vadd.f32 %v324_v45, %v56_v29  ;;  %v179_v49 = vpop.f32.mrb[3].mxu0  ;;  %v199_v50 = vpop.f32.mrb[3].mxu1  ;;  %v205_v1 = vadd.f32 %v330_v46, %v76_v62  ;;  %v269_v7 = vmul.f32 %v252_v3, %v213_v63 }
  0xde   :  { %v264_v51 = vmul.f32 %v227_v30, %v208_v44  ;;  %v180_v53 = vadd.f32 %v179_v49, %v51_v27  ;;  %v200_v61 = vadd.f32 %v199_v50, %v71_v42  ;;  %v268_v4 = vmul.f32 %v247_v54, %v212_v59 }
  0xdf   :  { %v211_v57 = vmax.f32 %v185_v48, 0.0  ;;  %v215_v8 = vmax.f32 %v205_v1, 0.0 }
  0xe0   :  { %v272_v56 = vadd.f32 %v265_v47, %v264_v51  ;;  %v210_v58 = vmax.f32 %v180_v53, 0.0  ;;  %v214_v6 = vmax.f32 %v200_v61, 0.0 }
  0xe1   :  { %v267_v0 = vmul.f32 %v242_v35, %v211_v57  ;;  %v271_v14 = vmul.f32 %v262_v13, %v215_v8 }
  0xe2   :  { %v266_v60 = vmul.f32 %v237_v33, %v210_v58  ;;  %v270_v11 = vmul.f32 %v257_v10, %v214_v6 }
  0xe4   :  { %v273_v2 = vadd.f32 %v272_v56, %v266_v60 }
  0xe6   :  { %v274_v5 = vadd.f32 %v273_v2, %v267_v0 }
  0xe8   :  { %v275_v9 = vadd.f32 %v274_v5, %v268_v4 }
  0xea   :  { %v276_v12 = vadd.f32 %v275_v9, %v269_v7 }
  0xec   :  { %v277_v15 = vadd.f32 %v276_v12, %v270_v11 }
  0xee   :  { %v278_v16 = vadd.f32 %v277_v15, %v271_v14 }
  0xf0   :  { %v279_v17 = vrot.slane %v278_v16, 4 }
  0xf2   :  { %v280_v18 = vadd.f32 %v279_v17, %v278_v16 }
  0xf4   :  { %v281_v19 = vrot.slane %v280_v18, 2 }
  0xf6   :  { %v282_v20 = vadd.f32 %v281_v19, %v280_v18 }
  0xf8   :  { %v283_v21 = vrot.slane %v282_v20, 1 }
  0xfa   :  { %v284_v23 = vadd.f32 %v283_v21, %v282_v20 }
  0xfc   :  { %v287_v24 = vadd.f32 %v286_v22, %v284_v23 }
  0xfe   :  { %v307_v25 = vmul.f32 -1.442695, %v287_v24 }
 0x100   :  { %336 = vpow2.f32 %v307_v25 }
 0x10a   :  { %v337_v26 = vpop.eup %336 }
 0x10b   :  { %v291_v27 = vadd.f32 1.0, %v337_v26 }
 0x10d   :  { %338 = vrcp.f32 %v291_v27 }
 0x117   :  { %v339_v28 = vpop.eup %338 }
 0x118   :  { %294 = vst [vmem:[%s465_s5] sm:$0x1] %v339_v28 }

</bundles_post_ra>
